<compile_context>
chip_gen: v6e
topology: v6e:2x2x1
jax: 0.10.0
libtpu: 0.0.40
codegen_flags: <defaults>
</compile_context>

<pallas_src>
import functools

import jax
import jax.numpy as jnp
from jax.experimental import pallas as pl
from jax.experimental.pallas import tpu as pltpu

HIDDEN = 768
LANE = 128
DROPOUT_P = 0.3
_KEEP_SCALE = 1.0 / (1.0 - DROPOUT_P)
# int32 random bits are uniform in [0, 2**31 - 1); keep iff bits >= threshold.
_DROP_THRESHOLD = int(round(DROPOUT_P * (2 ** 31 - 1)))


# ----------------------------------------------------------------------------
# Kernels
# ----------------------------------------------------------------------------
def _train_head_kernel(x_ref, bits_ref, w1_ref, b1_ref, w2_ref, b2_ref, o_ref):
    # dense: [tB, H] @ [H, H] (bf16 on the MXU, f32 accumulate) + bias (f32)
    x = x_ref[...].astype(jnp.bfloat16)
    h = jnp.dot(x, w1_ref[...], preferred_element_type=jnp.float32) + b1_ref[...]

    # Dropout(p=0.3): integer threshold compare on pre-generated bits,
    # inverted-dropout scaling kept in f32 (v5e-friendly).
    keep = bits_ref[...] >= jnp.int32(_DROP_THRESHOLD)
    h = jnp.where(keep, h * jnp.float32(_KEEP_SCALE), jnp.float32(0.0))

    # classifier: [tB, H] @ [H, C_pad] + bias, lane-dense (128-wide) output.
    logits = jnp.dot(h.astype(jnp.bfloat16), w2_ref[...],
                     preferred_element_type=jnp.float32) + b2_ref[...]
    o_ref[...] = logits.astype(o_ref.dtype)


def _eval_head_kernel(x_ref, wf_ref, bf_ref, o_ref):
    # Eval: dropout is identity -> the two linears were folded in the wrapper
    # into a single tiny [H, C_pad] weight; one matmul, lane-dense output.
    logits = jnp.dot(x_ref[...], wf_ref[...],
                     preferred_element_type=jnp.float32) + bf_ref[...]
    o_ref[...] = logits.astype(o_ref.dtype)


# ----------------------------------------------------------------------------
# Wrapper
# ----------------------------------------------------------------------------
def _round_up(x, m):
    return ((x + m - 1) // m) * m


def _pad_cols(a, target_cols):
    pad = target_cols - a.shape[-1]
    if pad <= 0:
        return a
    return jnp.pad(a, ((0, 0), (0, pad)))


def _pick_tile_b(batch):
    # Keep (2 buffers x tile_B x 768 x 4B) + weights far below v7x's 64 MiB.
    if batch <= 256:
        return batch
    if batch % 256 == 0:
        return 256
    return batch  # TODO(synk): pad ragged batches instead of one big tile.


def make_dropout_bits(key, batch):
    """int32 uniform bits in [0, 2**31 - 1) used for the dropout mask."""
    return jax.random.randint(key, (batch, HIDDEN), 0, 2 ** 31 - 1,
                              dtype=jnp.int32)


def longformer_content_head(pooled, w1, b1, w2, b2, *, training=False,
                            dropout_bits=None):
    """pooled: [B,768] f32; w1: [768,768]; b1: [1,768]; w2: [768,C]; b2: [1,C]."""
    B, H = pooled.shape
    assert H == HIDDEN
    C = w2.shape[1]
    C_pad = max(LANE, _round_up(C, LANE))
    tile_b = _pick_tile_b(B)
    grid = (B // tile_b,)

    w2_pad = _pad_cols(w2.astype(jnp.float32), C_pad)
    b2_pad = _pad_cols(b2.astype(jnp.float32), C_pad)

    cparams = pltpu.CompilerParams(dimension_semantics=("parallel",))
    out_shape = jax.ShapeDtypeStruct((B, C_pad), jnp.float32)
    x_spec = pl.BlockSpec((tile_b, H), lambda i: (i, 0))
    out_spec = pl.BlockSpec((tile_b, C_pad), lambda i: (i, 0))

    if training:
        if dropout_bits is None:
            raise ValueError("training=True requires dropout_bits "
                             "(see make_dropout_bits).")
        w1_bf = w1.astype(jnp.bfloat16)
        w2_bf = w2_pad.astype(jnp.bfloat16)
        cost = pl.CostEstimate(
            flops=2 * B * H * (H + C_pad),
            transcendentals=0,
            bytes_accessed=(pooled.size * 4 + dropout_bits.size * 4
                            + w1_bf.size * 2 + b1.size * 4
                            + w2_bf.size * 2 + b2_pad.size * 4
                            + B * C_pad * 4),
        )
        grid_spec = pltpu.PrefetchScalarGridSpec(
            num_scalar_prefetch=0,
            grid=grid,
            in_specs=[
                x_spec,                                         # pooled
                pl.BlockSpec((tile_b, H), lambda i: (i, 0)),    # dropout bits
                pl.BlockSpec((H, H), lambda i: (0, 0)),         # w1 (bf16)
                pl.BlockSpec((1, H), lambda i: (0, 0)),         # b1 (f32)
                pl.BlockSpec((H, C_pad), lambda i: (0, 0)),     # w2 (bf16, padded)
                pl.BlockSpec((1, C_pad), lambda i: (0, 0)),     # b2 (f32, padded)
            ],
            out_specs=out_spec,
        )
        logits_full = pl.pallas_call(
            _train_head_kernel,
            out_shape=out_shape,
            grid_spec=grid_spec,
            compiler_params=cparams,
            cost_estimate=cost,
        )(pooled, dropout_bits, w1_bf, b1.astype(jnp.float32), w2_bf, b2_pad)
    else:
        # Fold the two linears (dropout is identity in eval): one tiny matmul.
        w_fused = jnp.dot(w1.astype(jnp.float32), w2_pad)        # [H, C_pad]
        b_fused = jnp.dot(b1.astype(jnp.float32), w2_pad) + b2_pad  # [1, C_pad]
        cost = pl.CostEstimate(
            flops=2 * B * H * C_pad,
            transcendentals=0,
            bytes_accessed=(pooled.size * 4 + w_fused.size * 4
                            + b_fused.size * 4 + B * C_pad * 4),
        )
        grid_spec = pltpu.PrefetchScalarGridSpec(
            num_scalar_prefetch=0,
            grid=grid,
            in_specs=[
                x_spec,                                         # pooled
                pl.BlockSpec((H, C_pad), lambda i: (0, 0)),     # fused weight
                pl.BlockSpec((1, C_pad), lambda i: (0, 0)),     # fused bias
            ],
            out_specs=out_spec,
        )
        logits_full = pl.pallas_call(
            _eval_head_kernel,
            out_shape=out_shape,
            grid_spec=grid_spec,
            compiler_params=cparams,
            cost_estimate=cost,
        )(pooled, w_fused, b_fused)

    return logits_full[:, :C]


def cross_entropy_ignore_index(logits, labels, ignore_index=-1):
    # Glue-level equivalent of torch.nn.CrossEntropyLoss(ignore_index=-1)
    # applied to logits.view(-1, 2), class_label.view(-1).
    # NOTE: mirrors the PyTorch code's hard-coded .view(-1, 2); it assumes the
    # head was built with num_classes == 2.
    logits2 = logits.reshape(-1, 2)
    labels = labels.reshape(-1)
    valid = labels != ignore_index
    logp = jax.nn.log_softmax(logits2, axis=-1)
    safe = jnp.where(valid, labels, 0)
    nll = -jnp.take_along_axis(logp, safe[:, None], axis=-1)[:, 0]
    denom = jnp.maximum(jnp.sum(valid.astype(jnp.float32)), 1.0)
    return jnp.sum(jnp.where(valid, nll, 0.0)) / denom


def _torch_linear_init(key, fan_in, shape):
    # torch.nn.Linear default init range: U(-1/sqrt(fan_in), 1/sqrt(fan_in)).
    bound = 1.0 / jnp.sqrt(jnp.float32(fan_in))
    return jax.random.uniform(key, shape, jnp.float32, -bound, bound)


if __name__ == "__main__":
    B = 2
    NUM_CLASSES = 2

    key = jax.random.PRNGKey(0)
    k_pool, k_w1, k_b1, k_w2, k_b2, k_lbl = jax.random.split(key, 6)

    # Stand-in for long_output[1] (Longformer pooler output).
    pooled = jax.random.normal(k_pool, (B, HIDDEN), dtype=jnp.float32)

    # dense = Linear(768, 768); classifier = Linear(768, num_classes)
    w1 = _torch_linear_init(k_w1, HIDDEN, (HIDDEN, HIDDEN))
    b1 = _torch_linear_init(k_b1, HIDDEN, (1, HIDDEN))
    w2 = _torch_linear_init(k_w2, HIDDEN, (HIDDEN, NUM_CLASSES))
    b2 = _torch_linear_init(k_b2, HIDDEN, (1, NUM_CLASSES))

    class_label = jax.random.randint(k_lbl, (B,), 0, NUM_CLASSES, dtype=jnp.int32)

    # ---- Eval-mode forward (dropout identity, fused single-matmul kernel) ----
    logits = longformer_content_head(pooled, w1, b1, w2, b2, training=False)
    jax.block_until_ready(logits)
    assert logits.shape == (B, NUM_CLASSES)

    ref_eval = (pooled @ w1 + b1) @ w2 + b2
    assert jnp.allclose(logits, ref_eval, atol=5e-2, rtol=5e-2), \
        "eval logits mismatch vs reference"

    # ---- Training-mode forward (bf16 MXU + deterministic dropout bits) ----
    bits = make_dropout_bits(jax.random.PRNGKey(1234), B)
    logits_train = longformer_content_head(pooled, w1, b1, w2, b2,
                                           training=True, dropout_bits=bits)
    jax.block_until_ready(logits_train)
    assert logits_train.shape == (B, NUM_CLASSES)

    keep = bits >= _DROP_THRESHOLD
    h_ref = pooled @ w1 + b1
    h_ref = jnp.where(keep, h_ref * _KEEP_SCALE, 0.0)
    ref_train = h_ref @ w2 + b2
    assert jnp.allclose(logits_train, ref_train, atol=8e-2, rtol=8e-2), \
        "training logits mismatch vs reference"
    assert bool(jnp.all(jnp.isfinite(logits_train)))

    # ---- Optional loss branch of the forward (class_label is not None) ----
    loss = cross_entropy_ignore_index(logits, class_label)
    jax.block_until_ready(loss)
    assert bool(jnp.isfinite(loss))

    print("KERNEL_OK")
</pallas_src>

<mosaic_0001>
module attributes {stable_mosaic.version = 11 : i64} {
  func.func @_eval_head_kernel(%arg0: i32, %arg1: memref<2x768xf32, #tpu.memory_space<vmem>>, %arg2: memref<768x128xf32, #tpu.memory_space<vmem>>, %arg3: memref<1x128xf32, #tpu.memory_space<vmem>>, %arg4: memref<2x128xf32, #tpu.memory_space<vmem>>) attributes {dimension_semantics = [#tpu.dimension_semantics<parallel>], iteration_bounds = array<i64: 1>, scalar_prefetch = 0 : i64, scratch_operands = 0 : i64, tpu.core_type = #tpu.core_type<tc>, window_params = [{transform_indices = @transform_0, window_bounds = array<i64: 2, 768>}, {pipeline_mode = #tpu.pipeline_mode<synchronous>, transform_indices = @transform_1, window_bounds = array<i64: 768, 128>}, {pipeline_mode = #tpu.pipeline_mode<synchronous>, transform_indices = @transform_2, window_bounds = array<i64: 1, 128>}, {transform_indices = @transform_3, window_bounds = array<i64: 2, 128>}]} {
    %c0 = arith.constant 0 : index
    %c0_0 = arith.constant 0 : index
    %0 = vector.load %arg1[%c0, %c0_0] : memref<2x768xf32, #tpu.memory_space<vmem>>, vector<2x768xf32>
    %c0_1 = arith.constant 0 : index
    %c0_2 = arith.constant 0 : index
    %1 = vector.load %arg2[%c0_1, %c0_2] : memref<768x128xf32, #tpu.memory_space<vmem>>, vector<768x128xf32>
    %cst = arith.constant dense<0.000000e+00> : vector<2x128xf32>
    %2 = tpu.matmul %0, %1, %cst {dimension_numbers = #tpu.dot_dimension_numbers<[1], [0], [0], [1], [0, 0, 1, 1], [], []>} : vector<2x768xf32>, vector<768x128xf32>, vector<2x128xf32> -> vector<2x128xf32>
    %c0_3 = arith.constant 0 : index
    %c0_4 = arith.constant 0 : index
    %3 = vector.load %arg3[%c0_3, %c0_4] : memref<1x128xf32, #tpu.memory_space<vmem>>, vector<1x128xf32>
    %4 = vector.broadcast %3 : vector<1x128xf32> to vector<2x128xf32>
    %5 = arith.addf %2, %4 : vector<2x128xf32>
    %c0_5 = arith.constant 0 : index
    %c0_6 = arith.constant 0 : index
    %6 = vector.load %arg4[%c0_5, %c0_6] : memref<2x128xf32, #tpu.memory_space<vmem>>, vector<2x128xf32>
    tpu.vector_store %arg4[%c0_5, %c0_6], %5 {strides = array<i32>} : memref<2x128xf32, #tpu.memory_space<vmem>>, vector<2x128xf32>,
    return
  }
  func.func @transform_0(%arg0: i32) -> (i32, i32) {
    %c0_i32 = arith.constant 0 : i32
    %c0_i32_0 = arith.constant 0 : i32
    return %arg0, %c0_i32 : i32, i32
  }
  func.func @transform_1(%arg0: i32) -> (i32, i32) {
    %c0_i32 = arith.constant 0 : i32
    %c0_i32_0 = arith.constant 0 : i32
    %c0_i32_1 = arith.constant 0 : i32
    return %c0_i32, %c0_i32_0 : i32, i32
  }
  func.func @transform_2(%arg0: i32) -> (i32, i32) {
    %c0_i32 = arith.constant 0 : i32
    %c0_i32_0 = arith.constant 0 : i32
    %c0_i32_1 = arith.constant 0 : i32
    return %c0_i32, %c0_i32_0 : i32, i32
  }
  func.func @transform_3(%arg0: i32) -> (i32, i32) {
    %c0_i32 = arith.constant 0 : i32
    %c0_i32_0 = arith.constant 0 : i32
    return %arg0, %c0_i32 : i32, i32
  }
}

</mosaic_0001>

<bundles_post_ra>
// kernel: tpu_custom_call.1
= control target key start
LH: loop header
LB: loop body
LE: loop exit
PB: predicated region body
PF: predicated region fallthrough
CT: control target
= control target key end

     0   :  { %8 = vsyncpa [#allocation3], 0  ;;  %s629_s0 = inlined_call_operand.hbm [shape: f32[2,768], index: 0, kind: input, shape index: {}]   ;;  %s630_s1 = inlined_call_operand.hbm [shape: f32[768,128], index: 1, kind: input, shape index: {}]   ;;  %s631_s2 = inlined_call_operand.vmem [shape: f32[1,128], index: 2, kind: input, shape index: {}]   ;;  %s632_s3 = inlined_call_operand.hbm [shape: f32[2,128], index: 3, kind: output, shape index: {}]  }
   0x1   :  { %9 = vsyncpa [#allocation6], 0 }
   0x2   :  { %10 = vsyncpa [#allocation4], 0  ;;  %s586_s12 = smov [#allocation2]   ;;  %s587_s14 = smov [#allocation5]  }
   0x3   :  { %s17_s13 = sshll.u32 %s586_s12, 4  ;;  %s26_s15 = sshll.u32 %s587_s14, 4  ;;  %s18_s13 = int_to_ptr.vmem [resolvable:$true] %s17_s13  ;;  %s27_s15 = int_to_ptr.vmem [resolvable:$true] %s26_s15 }
   0x4   :  { %s528_s16 = scalar_lea.vmem %s18_s13, 192  ;;  %p533_p1 = scmp.lt.s32.totalorder %s18_s13, %s18_s13 }
   0x5   :  { %p529_p0 = scmp.ne.s32.totalorder %s18_s13, %s528_s16  ;;  %p534_p2 = scmp.lt.s32.totalorder %s528_s16, %s528_s16 }
   0x7   :  { %p535_p3 = por %p534_p2, %p533_p1 }
   0x9   :  { %p536_p4 = pnand %p535_p3, %p529_p0 }
   0xb   :  { %539 = shalt.err (!%p536_p4)
}
   0xc   :  { %20 = dma.hbm_to_vmem [thread:$0]  %s629_s0, 192, %s18_s13, [#allocation3]  }
   0xd   :  { %s548_s19 = scalar_lea.vmem %s27_s15, 12288  ;;  %p553_p6 = scmp.lt.s32.totalorder %s27_s15, %s27_s15 }
   0xe   :  { %p549_p5 = scmp.ne.s32.totalorder %s27_s15, %s548_s19  ;;  %p554_p7 = scmp.lt.s32.totalorder %s548_s19, %s548_s19 }
  0x10   :  { %p555_p8 = por %p554_p7, %p553_p6 }
  0x12   :  { %p556_p9 = pnand %p555_p8, %p549_p5 }
  0x14   :  { %559 = shalt.err (!%p556_p9)
}
  0x15   :  { %s588_s20 = smov 128   ;;  %s589_s21 = smov 8  }
  0x16   :  { %32 = dma.hbm_to_vmem [thread:$0]  %s630_s1, 12288, %s27_s15, [#allocation6], %s588_s20, %s588_s20, %s589_s21  }
  0x17   :  { %580 = dma.done.wait [#allocation3], 192  }
  0x18   :  { %581 = vsyncadd [#allocation3], 4294967104 }
  0x19   :  { %582 = dma.done.wait [#allocation6], 12288  }
  0x1a   :  { %583 = vsyncadd [#allocation6], 4294955008  ;;  %v74_v0 = vld [vmem:[#allocation5 + $0xf8] sm:$0xff]  ;;  %v73_v2 = vld [vmem:[#allocation5 + $0xf0] sm:$0xff]  ;;  %v590_v27 = vmov 1983009808   ;;  %v152_v29 = vlaneseq }
  0x1b   :  { %v58_v1 = vld [vmem:[#allocation5 + $0x78] sm:$0xff]  ;;  %408 = vmatprep.subr.mxu0 %v74_v0  ;;  %v57_v4 = vld [vmem:[#allocation5 + $0x70] sm:$0xff]  ;;  %v72_v6 = vld [vmem:[#allocation5 + $0xe8] sm:$0xff]  ;;  %v150_v28 = vunpack.c.l.s4 %v590_v27  ;;  %s591_s24 = smov [#allocation7]  }
  0x1c   :  { %v106_v3 = vld [vmem:[#allocation5 + $0x1f8] sm:$0xff]  ;;  %409 = vmatpush3.msra.mxu0 %v58_v1  ;;  %v105_v7 = vld [vmem:[#allocation5 + $0x1f0] sm:$0xff]  ;;  %v56_v8 = vld [vmem:[#allocation5 + $0x68] sm:$0xff]  ;;  %v153_v39 = vshrl.u32 %v152_v29, 7  ;;  %s396_s25 = sshll.u32 %s591_s24, 4  ;;  %s397_s25 = int_to_ptr.vmem [resolvable:$true] %s396_s25 }
  0x1d   :  { %v90_v5 = vld [vmem:[#allocation5 + $0x178] sm:$0xff]  ;;  %443 = vmatprep.subr.mxu1 %v106_v3  ;;  %410 = vmatprep.subr.mxu0 %v73_v2  ;;  %v89_v9 = vld [vmem:[#allocation5 + $0x170] sm:$0xff]  ;;  %v104_v10 = vld [vmem:[#allocation5 + $0x1e8] sm:$0xff]  ;;  %v151_v38 = vunpack.c.0.s8 %v150_v28  ;;  %s560_s26 = scalar_lea.vmem %s397_s25, 32  ;;  %p565_p11 = scmp.lt.s32.totalorder %s397_s25, %s397_s25 }
  0x1e   :  { %444 = vmatpush3.msra.mxu1 %v90_v5  ;;  %411 = vmatpush3.msra.mxu0 %v57_v4  ;;  %v71_v11 = vld [vmem:[#allocation5 + $0xe0] sm:$0xff]  ;;  %v88_v12 = vld [vmem:[#allocation5 + $0x168] sm:$0xff]  ;;  %v70_v15 = vld [vmem:[#allocation5 + $0xd8] sm:$0xff]  ;;  %p561_p10 = scmp.ne.s32.totalorder %s397_s25, %s560_s26  ;;  %p566_p12 = scmp.lt.s32.totalorder %s560_s26, %s560_s26 }
  0x1f   :  { %445 = vmatprep.subr.mxu1 %v105_v7  ;;  %412 = vmatprep.subr.mxu0 %v72_v6  ;;  %v55_v13 = vld [vmem:[#allocation5 + $0x60] sm:$0xff]  ;;  %v54_v17 = vld [vmem:[#allocation5 + $0x58] sm:$0xff]  ;;  %v69_v19 = vld [vmem:[#allocation5 + $0xd0] sm:$0xff]  ;;  %v154_v48 = vsub.s32 %v151_v38, %v153_v39 }
  0x20   :  { %446 = vmatpush3.msra.mxu1 %v89_v9  ;;  %v103_v14 = vld [vmem:[#allocation5 + $0x1e0] sm:$0xff]  ;;  %413 = vmatpush3.msra.mxu0 %v56_v8  ;;  %v102_v18 = vld [vmem:[#allocation5 + $0x1d8] sm:$0xff]  ;;  %v53_v21 = vld [vmem:[#allocation5 + $0x50] sm:$0xff]  ;;  %p567_p13 = por %p566_p12, %p565_p11 }
  0x21   :  { %447 = vmatprep.subr.mxu1 %v104_v10  ;;  %v87_v16 = vld [vmem:[#allocation5 + $0x160] sm:$0xff]  ;;  %414 = vmatprep.subr.mxu0 %v71_v11  ;;  %v86_v20 = vld [vmem:[#allocation5 + $0x158] sm:$0xff]  ;;  %v101_v22 = vld [vmem:[#allocation5 + $0x1d0] sm:$0xff] }
  0x22   :  { %448 = vmatpush3.msra.mxu1 %v88_v12  ;;  %415 = vmatpush3.msra.mxu0 %v55_v13  ;;  %v68_v23 = vld [vmem:[#allocation5 + $0xc8] sm:$0xff]  ;;  %v85_v24 = vld [vmem:[#allocation5 + $0x150] sm:$0xff]  ;;  %v67_v30 = vld [vmem:[#allocation5 + $0xc0] sm:$0xff]  ;;  %p568_p0 = pnand %p567_p13, %p561_p10 }
  0x23   :  { %449 = vmatprep.subr.mxu1 %v103_v14  ;;  %416 = vmatprep.subr.mxu0 %v70_v15  ;;  %v52_v25 = vld [vmem:[#allocation5 + $0x48] sm:$0xff]  ;;  %v51_v32 = vld [vmem:[#allocation5 + $0x40] sm:$0xff]  ;;  %v66_v34 = vld [vmem:[#allocation5 + $0xb8] sm:$0xff] }
  0x24   :  { %450 = vmatpush3.msra.mxu1 %v87_v16  ;;  %417 = vmatpush3.msra.mxu0 %v54_v17  ;;  %v100_v26 = vld [vmem:[#allocation5 + $0x1c8] sm:$0xff]  ;;  %v99_v33 = vld [vmem:[#allocation5 + $0x1c0] sm:$0xff]  ;;  %v50_v36 = vld [vmem:[#allocation5 + $0x38] sm:$0xff] }
  0x25   :  { %451 = vmatprep.subr.mxu1 %v102_v18  ;;  %418 = vmatprep.subr.mxu0 %v69_v19  ;;  %v84_v31 = vld [vmem:[#allocation5 + $0x148] sm:$0xff]  ;;  %v83_v35 = vld [vmem:[#allocation5 + $0x140] sm:$0xff]  ;;  %v98_v37 = vld [vmem:[#allocation5 + $0x1b8] sm:$0xff] }
  0x26   :  { %452 = vmatpush3.msra.mxu1 %v86_v20  ;;  %419 = vmatpush3.msra.mxu0 %v53_v21  ;;  %v65_v40 = vld [vmem:[#allocation5 + $0xb0] sm:$0xff]  ;;  %v82_v41 = vld [vmem:[#allocation5 + $0x138] sm:$0xff]  ;;  %v64_v44 = vld [vmem:[#allocation5 + $0xa8] sm:$0xff] }
  0x27   :  { %453 = vmatprep.subr.mxu1 %v101_v22  ;;  %420 = vmatprep.subr.mxu0 %v68_v23  ;;  %v49_v42 = vld [vmem:[#allocation5 + $0x30] sm:$0xff]  ;;  %v48_v46 = vld [vmem:[#allocation5 + $0x28] sm:$0xff]  ;;  %v63_v49 = vld [vmem:[#allocation5 + $0xa0] sm:$0xff] }
  0x28   :  { %454 = vmatpush3.msra.mxu1 %v85_v24  ;;  %421 = vmatpush3.msra.mxu0 %v52_v25  ;;  %v97_v43 = vld [vmem:[#allocation5 + $0x1b0] sm:$0xff]  ;;  %v96_v47 = vld [vmem:[#allocation5 + $0x1a8] sm:$0xff]  ;;  %v47_v52 = vld [vmem:[#allocation5 + $0x20] sm:$0xff] }
  0x29   :  { %455 = vmatprep.subr.mxu1 %v100_v26  ;;  %422 = vmatprep.subr.mxu0 %v67_v30  ;;  %v81_v45 = vld [vmem:[#allocation5 + $0x130] sm:$0xff]  ;;  %v80_v50 = vld [vmem:[#allocation5 + $0x128] sm:$0xff]  ;;  %v95_v53 = vld [vmem:[#allocation5 + $0x1a0] sm:$0xff] }
  0x2a   :  { %456 = vmatpush3.msra.mxu1 %v84_v31  ;;  %423 = vmatpush3.msra.mxu0 %v51_v32  ;;  %v41_v51 = vld [vmem:[#allocation2] sm:$0xff]  ;;  %v79_v55 = vld [vmem:[#allocation5 + $0x120] sm:$0xff]  ;;  %v60_v0 = vld [vmem:[#allocation5 + $0x88] sm:$0xff] }
  0x2b   :  { %457 = vmatprep.subr.mxu1 %v99_v33  ;;  %424 = vmatprep.subr.mxu0 %v66_v34  ;;  %v62_v54 = vld [vmem:[#allocation5 + $0x98] sm:$0xff]  ;;  %v155_v58 = vrot.slane %v41_v51, %v154_v48  ;;  %v148_v59 = vcombine.high %v41_v51, %v41_v51  ;;  %v61_v60 = vld [vmem:[#allocation5 + $0x90] sm:$0xff]  ;;  %v44_v2 = vld [vmem:[#allocation5 + $0x8] sm:$0xff] }
  0x2c   :  { %458 = vmatpush3.msra.mxu1 %v83_v35  ;;  %425 = vmatpush3.msra.mxu0 %v50_v36  ;;  %v46_v56 = vld [vmem:[#allocation5 + $0x18] sm:$0xff]  ;;  %v45_v62 = vld [vmem:[#allocation5 + $0x10] sm:$0xff]  ;;  %v92_v3 = vld [vmem:[#allocation5 + $0x188] sm:$0xff] }
  0x2d   :  { %459 = vmatprep.subr.mxu1 %v98_v37  ;;  %426 = vmatprep.subr.mxu0 %v65_v40  ;;  %v94_v57 = vld [vmem:[#allocation5 + $0x198] sm:$0xff]  ;;  %v93_v63 = vld [vmem:[#allocation5 + $0x190] sm:$0xff]  ;;  %v163_v4 = vcombine.high %v155_v58, %v155_v58  ;;  %v162_v5 = vrot.slane %v148_v59, %v154_v48  ;;  %v59_v6 = vld [vmem:[#allocation5 + $0x80] sm:$0xff] }
  0x2e   :  { %460 = vmatpush3.msra.mxu1 %v82_v41  ;;  %427 = vmatpush3.msra.mxu0 %v49_v42  ;;  %v78_v61 = vld [vmem:[#allocation5 + $0x118] sm:$0xff]  ;;  %v77_v1 = vld [vmem:[#allocation5 + $0x110] sm:$0xff]  ;;  %v43_v7 = vld [vmem:[#allocation5] sm:$0xff] }
  0x2f   :  { %461 = vmatprep.subr.mxu1 %v97_v43  ;;  %428 = vmatprep.subr.mxu0 %v64_v44  ;;  %v76_v8 = vld [vmem:[#allocation5 + $0x108] sm:$0xff]  ;;  %v91_v9 = vld [vmem:[#allocation5 + $0x180] sm:$0xff]  ;;  %v138_v10 = vld [vmem:[#allocation5 + $0x2f8] sm:$0xff]  ;;  %v164_v12 = vcombine.high %v162_v5, %v162_v5 }
  0x30   :  { %462 = vmatpush3.msra.mxu1 %v81_v45  ;;  %429 = vmatpush3.msra.mxu0 %v48_v46  ;;  %v75_v11 = vld [vmem:[#allocation5 + $0x100] sm:$0xff]  ;;  %v122_v13 = vld [vmem:[#allocation5 + $0x278] sm:$0xff]  ;;  %v137_v15 = vld [vmem:[#allocation5 + $0x2f0] sm:$0xff] }
  0x31   :  { %463 = vmatprep.subr.mxu1 %v96_v47  ;;  %430 = vmatprep.subr.mxu0 %v63_v49  ;;  %v618_v14 = vld.sshfl [vmem:[#allocation2 + $0x8] sm:$0x33 pattern:$0x76325410]  ;;  %v121_v17 = vld [vmem:[#allocation5 + $0x270] sm:$0xff]  ;;  %v136_v18 = vld [vmem:[#allocation5 + $0x2e8] sm:$0xff] }
  0x32   :  { %464 = vmatpush3.msra.mxu1 %v80_v50  ;;  %431 = vmatpush3.msra.mxu0 %v47_v52  ;;  %v172_v16 = vcombine.high %v618_v14, %v618_v14  ;;  %v120_v19 = vld [vmem:[#allocation5 + $0x268] sm:$0xff]  ;;  %v135_v20 = vld [vmem:[#allocation5 + $0x2e0] sm:$0xff]  ;;  %v134_v22 = vld [vmem:[#allocation5 + $0x2d8] sm:$0xff] }
  0x33   :  { %465 = vmatprep.subr.mxu1 %v95_v53  ;;  %432 = vmatprep.subr.mxu0 %v62_v54  ;;  %v119_v21 = vld [vmem:[#allocation5 + $0x260] sm:$0xff]  ;;  %v118_v23 = vld [vmem:[#allocation5 + $0x258] sm:$0xff]  ;;  %v133_v24 = vld [vmem:[#allocation5 + $0x2d0] sm:$0xff] }
  0x34   :  { %466 = vmatpush3.msra.mxu1 %v79_v55  ;;  %433 = vmatpush3.msra.mxu0 %v46_v56  ;;  %v117_v25 = vld [vmem:[#allocation5 + $0x250] sm:$0xff]  ;;  %v132_v26 = vld [vmem:[#allocation5 + $0x2c8] sm:$0xff]  ;;  %v131_v28 = vld [vmem:[#allocation5 + $0x2c0] sm:$0xff] }
  0x35   :  { %467 = vmatprep.subr.mxu1 %v94_v57  ;;  %434 = vmatprep.subr.mxu0 %v61_v60  ;;  %v116_v27 = vld [vmem:[#allocation5 + $0x248] sm:$0xff]  ;;  %v115_v29 = vld [vmem:[#allocation5 + $0x240] sm:$0xff]  ;;  %v130_v30 = vld [vmem:[#allocation5 + $0x2b8] sm:$0xff] }
  0x36   :  { %468 = vmatpush3.msra.mxu1 %v78_v61  ;;  %435 = vmatpush3.msra.mxu0 %v45_v62  ;;  %v114_v31 = vld [vmem:[#allocation5 + $0x238] sm:$0xff]  ;;  %v129_v32 = vld [vmem:[#allocation5 + $0x2b0] sm:$0xff]  ;;  %v128_v34 = vld [vmem:[#allocation5 + $0x2a8] sm:$0xff] }
  0x37   :  { %469 = vmatprep.subr.mxu1 %v93_v63  ;;  %436 = vmatprep.subr.mxu0 %v60_v0  ;;  %v113_v33 = vld [vmem:[#allocation5 + $0x230] sm:$0xff]  ;;  %v112_v35 = vld [vmem:[#allocation5 + $0x228] sm:$0xff]  ;;  %v127_v36 = vld [vmem:[#allocation5 + $0x2a0] sm:$0xff] }
  0x38   :  { %470 = vmatpush3.msra.mxu1 %v77_v1  ;;  %437 = vmatpush3.msra.mxu0 %v44_v2  ;;  %v111_v37 = vld [vmem:[#allocation5 + $0x220] sm:$0xff]  ;;  %v126_v38 = vld [vmem:[#allocation5 + $0x298] sm:$0xff]  ;;  %v125_v40 = vld [vmem:[#allocation5 + $0x290] sm:$0xff] }
  0x39   :  { %471 = vmatprep.subr.mxu1 %v92_v3  ;;  %438 = vmatprep.subr.mxu0 %v59_v6  ;;  %v110_v39 = vld [vmem:[#allocation5 + $0x218] sm:$0xff]  ;;  %v109_v41 = vld [vmem:[#allocation5 + $0x210] sm:$0xff]  ;;  %v124_v42 = vld [vmem:[#allocation5 + $0x288] sm:$0xff] }
  0x3a   :  { %243 = vmatprep.mubr.f32.mxu0 %v163_v4  ;;  %439 = vmatpush3.msra.mxu0 %v43_v7  ;;  %v108_v43 = vld [vmem:[#allocation5 + $0x208] sm:$0xff]  ;;  %v123_v44 = vld [vmem:[#allocation5 + $0x280] sm:$0xff]  ;;  %v406_v50 = vld [vmem:[%s631_s2] ss:$0 sm:$0xff] }
  0x3b   :  { %472 = vmatpush3.msra.mxu1 %v76_v8  ;;  %244 = vmatmul.mubr.f32.vlgmr.msra.gmra.mxu0 %v155_v58  ;;  %v107_v45 = vld [vmem:[#allocation5 + $0x200] sm:$0xff] }
  0x3c   :  { %473 = vmatprep.subr.mxu1 %v91_v9  ;;  %478 = vmatprep.subr.mxu0 %v138_v10 }
  0x3d   :  { %474 = vmatpush3.msra.mxu1 %v75_v11  ;;  %313 = vmatprep.mubr.f32.mxu1 %v164_v12 }
  0x3e   :  { %479 = vmatpush3.msra.mxu0 %v122_v13  ;;  %314 = vmatmul.mubr.f32.vlgmr.msra.gmra.mxu1 %v162_v5 }
  0x3f   :  { %480 = vmatprep.subr.mxu0 %v137_v15  ;;  %383 = vmatprep.mubr.f32.mxu0 %v172_v16 }
  0x40   :  { %481 = vmatpush3.msra.mxu0 %v121_v17 }
  0x41   :  { %482 = vmatprep.subr.mxu0 %v136_v18 }
  0x42   :  { %483 = vmatpush3.msra.mxu0 %v120_v19 }
  0x43   :  { %484 = vmatprep.subr.mxu0 %v135_v20 }
  0x44   :  { %485 = vmatpush3.msra.mxu0 %v119_v21 }
  0x45   :  { %486 = vmatprep.subr.mxu0 %v134_v22 }
  0x46   :  { %487 = vmatpush3.msra.mxu0 %v118_v23 }
  0x47   :  { %488 = vmatprep.subr.mxu0 %v133_v24 }
  0x48   :  { %489 = vmatpush3.msra.mxu0 %v117_v25 }
  0x49   :  { %490 = vmatprep.subr.mxu0 %v132_v26 }
  0x4a   :  { %491 = vmatpush3.msra.mxu0 %v116_v27 }
  0x4b   :  { %492 = vmatprep.subr.mxu0 %v131_v28 }
  0x4c   :  { %493 = vmatpush3.msra.mxu0 %v115_v29 }
  0x4d   :  { %494 = vmatprep.subr.mxu0 %v130_v30 }
  0x4e   :  { %495 = vmatpush3.msra.mxu0 %v114_v31 }
  0x4f   :  { %496 = vmatprep.subr.mxu0 %v129_v32 }
  0x50   :  { %497 = vmatpush3.msra.mxu0 %v113_v33 }
  0x51   :  { %498 = vmatprep.subr.mxu0 %v128_v34 }
  0x52   :  { %499 = vmatpush3.msra.mxu0 %v112_v35 }
  0x53   :  { %500 = vmatprep.subr.mxu0 %v127_v36 }
  0x54   :  { %501 = vmatpush3.msra.mxu0 %v111_v37 }
  0x55   :  { %502 = vmatprep.subr.mxu0 %v126_v38 }
  0x56   :  { %503 = vmatpush3.msra.mxu0 %v110_v39 }
  0x57   :  { %504 = vmatprep.subr.mxu0 %v125_v40 }
  0x58   :  { %505 = vmatpush3.msra.mxu0 %v109_v41 }
  0x59   :  { %506 = vmatprep.subr.mxu0 %v124_v42 }
  0x5a   :  { %507 = vmatpush3.msra.mxu0 %v108_v43 }
  0x5b   :  { %508 = vmatprep.subr.mxu0 %v123_v44 }
  0x5c   :  { %509 = vmatpush3.msra.mxu0 %v107_v45 }
  0x5d   :  { %384 = vmatmul.mubr.f32.vlgmr.msra.gmra.mxu0 %v618_v14 }
  0xfb   :  { %v440_v46 = vpop.f32.mrf.mxu0 }
  0xfd   :  { %v441_v47 = vpop.f32.mrf.mxu0 }
  0xfe   :  { %v475_v48 = vpop.f32.mrf.mxu1  ;;  %v442_v49 = vadd.f32 %v441_v47, %v440_v46 }
 0x100   :  { %v476_v51 = vpop.f32.mrf.mxu1  ;;  %v246_v52 = vadd.f32 %v442_v49, %v406_v50 }
 0x101   :  { %v477_v53 = vadd.f32 %v476_v51, %v475_v48 }
 0x103   :  { %v316_v56 = vadd.f32 %v477_v53, %v246_v52 }
 0x11d   :  { %v510_v54 = vpop.f32.mrf.mxu0 }
 0x11f   :  { %v511_v55 = vpop.f32.mrf.mxu0 }
 0x120   :  { %v512_v57 = vadd.f32 %v511_v55, %v510_v54 }
 0x122   :  { %v386_v58 = vadd.f32 %v512_v57, %v316_v56 }
 0x124   :  { %389 = vst [vmem:[#allocation7] sm:$0x3] %v386_v58 }
 0x125   :  { %571 = shalt.err (!%p568_p0)
}
 0x126   :  { %399 = dma.vmem_to_hbm [thread:$0]  %s397_s25, 32, %s632_s3, [#allocation4]  }
 0x127   :  { %584 = dma.done.wait [#allocation4], 32  }
 0x128   :  { %585 = vsyncadd [#allocation4], 4294967264 }
 0x129   :  { %403 = vsyncpa [#allocation3], 1 }
 0x12a   :  { %404 = vsyncpa [#allocation6], 1 }
 0x12b   :  { %405 = vsyncpa [#allocation4], 1 }

</bundles_post_ra>
